<compile_context>
chip_gen: v7x
topology: tpu7x:2x2x1
jax: 0.10.0
libtpu: 0.0.40
codegen_flags: <defaults>
</compile_context>

<pallas_src>
import functools

import jax
import jax.numpy as jnp
from jax import lax
from jax.experimental import pallas as pl
from jax.experimental.pallas import tpu as pltpu


def _default_vmem_limit_bytes():
    # Raise the scoped-VMEM ceiling above the 16/32 MiB defaults so large,
    # DMA-efficient blocks still fit, leaving headroom below physical VMEM
    # (v5e/v6e: 128 MiB -> ~96 MiB; v7x: 64 MiB -> ~48 MiB).
    try:
        cap = int(pltpu.get_tpu_info().vmem_capacity_bytes)
    except Exception:
        cap = 64 * 1024 * 1024          # conservative (v7x-sized) fallback
    return min((cap * 3) // 4, 100 * 1024 * 1024)


def _ffn_layer_kernel(x_ref, m_ref, w1_ref, b1_ref, w2_ref, b2_ref,
                      g_ref, bt_ref, o_ref, *, K, eps, use_mxu):
    # x_ref : [Bblk, C, T]  input block (PyTorch NCL layout, f32)
    # m_ref : [Bblk, 1, T]  mask block
    # w1_ref: [K, H, C]     conv1 weight per tap (bf16 on MXU path, f32 on VPU path)
    # b1_ref: [H, 1] f32    conv1 bias
    # w2_ref: [C, H]        conv2 (1x1) weight
    # b2_ref: [C, 1] f32    conv2 bias
    # g_ref : [C, 1] f32    LayerNorm gamma
    # bt_ref: [C, 1] f32    LayerNorm beta
    # o_ref : [Bblk, C, T]
    Bblk, C, T = x_ref.shape
    H = b1_ref.shape[0]
    pad = K // 2
    tap_dt = jnp.bfloat16 if use_mxu else jnp.float32

    # Grid-invariant params: load once per grid step (hoisted out of the batch
    # loop — JAX does not CSE reloads/broadcasts inside unrolled loops).
    w1v = [w1_ref[k] for k in range(K)]           # K x [H, C]
    w2v = w2_ref[...]                             # [C, H]
    b1v = b1_ref[...]                             # [H, 1]
    b2v = b2_ref[...]                             # [C, 1]
    gv = g_ref[...]                               # [C, 1]
    btv = bt_ref[...]                             # [C, 1]

    # Boundary 0/1 masks for the K 'same'-padding conv taps (lane-iota compare),
    # hoisted: they do not depend on the batch element.
    lane = lax.broadcasted_iota(jnp.int32, (1, T), 1)
    edge = []
    for k in range(K):
        s = k - pad
        edge.append(None if s == 0
                    else ((lane + s >= 0) & (lane + s < T)).astype(tap_dt))

    for b in range(Bblk):                         # static unroll; Bblk defaults to 1
        xb = x_ref[b]                             # [C, T] f32
        mb = m_ref[b]                             # [1, T] f32
        xm = xb * mb                              # mask before conv1 (FFN.forward)

        # ONE dtype cast before building the K taps (not K casts afterwards).
        src = xm.astype(tap_dt) if use_mxu else xm

        # Conv taps via pltpu.roll (XLU slot) — no concatenate/zeros VMEM copies.
        taps = []
        for k in range(K):
            s = k - pad
            if s == 0:
                taps.append(src)
            else:
                # tap[:, t] = src[:, t + s] for valid t, else 0
                taps.append(pltpu.roll(src, shift=(-s) % T, axis=1) * edge[k])

        # ---- conv1 ----
        if use_mxu:
            # K per-tap MXU matmuls (bf16 operands, f32 accumulate); no
            # [K*C, T] im2col buffer is ever materialized (VMEM-frugal on v7x).
            h = jnp.dot(w1v[0], taps[0], preferred_element_type=jnp.float32)
            for k in range(1, K):
                h = h + jnp.dot(w1v[k], taps[k],
                                preferred_element_type=jnp.float32)
        else:
            # Tiny C/H (e.g. C=4, H=16): an MXU tile would be <2% utilized,
            # so do the conv as VPU broadcast multiply-adds instead.
            h = jnp.zeros((H, T), jnp.float32)
            for k in range(K):
                for c in range(C):
                    h = h + w1v[k][:, c:c + 1] * taps[k][c:c + 1, :]

        h = jnp.maximum(h + b1v, 0.0)             # bias + ReLU (f32, VPU)
        # TODO(synk): FFN.drop / FFNLayer.dropout are identity in eval mode.
        h = h * mb                                # mask before conv2 (FFN.forward)

        # ---- conv2 (1x1) ----
        if use_mxu:
            y = jnp.dot(w2v, h.astype(jnp.bfloat16),
                        preferred_element_type=jnp.float32)
        else:
            y = jnp.zeros((C, T), jnp.float32)
            for j in range(H):
                y = y + w2v[:, j:j + 1] * h[j:j + 1, :]
        y = (y + b2v) * mb                        # FFN output mask

        # ---- residual + channel LayerNorm + final mask (fused) ----
        v = xb + y
        mean = jnp.mean(v, axis=0, keepdims=True)       # sublane reduce -> XLU
        centered = v - mean                             # reused for var AND norm
        var = jnp.mean(centered * centered, axis=0, keepdims=True)
        z = centered * lax.rsqrt(var + eps) * gv + btv
        o_ref[b] = (z * mb).astype(o_ref.dtype)


def ffn_layer_pallas(x, x_mask, w1, b1, w2, b2, gamma, beta, kernel_size, *,
                     eps=1e-5, batch_block=1, use_mxu=None,
                     vmem_limit_bytes=None):
    """
    x        : [B, C, T]  (PyTorch NCL layout, f32)
    x_mask   : [B, 1, T]
    w1       : [H, C, K]  Conv1d weight (H = C * scale)
    b1       : [H]
    w2       : [C, H, 1]  1x1 Conv1d weight
    b2       : [C]
    gamma    : [C]        LayerNorm weight
    beta     : [C]        LayerNorm bias
    returns  : [B, C, T]
    """
    B, C, T = x.shape
    K = kernel_size
    assert K % 2 == 1, "kernel_size must be odd ('same' padding semantics)"
    H = w1.shape[0]
    assert B % batch_block == 0

    if use_mxu is None:
        # Use the MXU only when the contraction / output dims fill real tiles;
        # otherwise the VPU broadcast-FMA path wins (MXU util < 2% at C=4,H=16).
        use_mxu = min(K * C, H) >= 64

    # Lane alignment: pad T to a multiple of 128 so every slice / the output
    # store is lane-dense (unmasked vst). The mask is zero-padded, so padded
    # columns are inert (conv sees zeros, LayerNorm output is re-masked) and
    # are sliced off on return.
    LANE = 128
    T_pad = ((T + LANE - 1) // LANE) * LANE
    if T_pad != T:
        x_in = jnp.pad(x, ((0, 0), (0, 0), (0, T_pad - T)))
        m_in = jnp.pad(x_mask, ((0, 0), (0, 0), (0, T_pad - T)))
    else:
        x_in, m_in = x, x_mask

    # bf16 weights for the MXU path (f32 for the VPU path); biases/norm params
    # stay f32 for the VPU. (v7x has no int MXU path; bf16 is the right choice.)
    wdt = jnp.bfloat16 if use_mxu else jnp.float32
    w1_khc = jnp.transpose(w1, (2, 0, 1)).astype(wdt)     # [K, H, C]
    w2_ch = w2[:, :, 0].astype(wdt)                       # [C, H]
    b1_c = b1.reshape(H, 1).astype(jnp.float32)
    b2_c = b2.reshape(C, 1).astype(jnp.float32)
    g_c = gamma.reshape(C, 1).astype(jnp.float32)
    bt_c = beta.reshape(C, 1).astype(jnp.float32)

    if vmem_limit_bytes is None:
        vmem_limit_bytes = _default_vmem_limit_bytes()

    kernel = functools.partial(_ffn_layer_kernel, K=K, eps=eps, use_mxu=use_mxu)

    grid = (B // batch_block,)   # >= 2 steps: enables pipelining + megacore
    # (If the input DMA becomes exposed at large T, bump the x/mask specs to a
    #  3-deep pipeline; not needed at these sizes.)
    out = pl.pallas_call(
        kernel,
        out_shape=jax.ShapeDtypeStruct((B, C, T_pad), x.dtype),
        grid_spec=pltpu.PrefetchScalarGridSpec(
            num_scalar_prefetch=0,
            grid=grid,
            in_specs=[
                pl.BlockSpec((batch_block, C, T_pad), lambda i: (i, 0, 0)),
                pl.BlockSpec((batch_block, 1, T_pad), lambda i: (i, 0, 0)),
                # grid-invariant params: constant block index -> fetched once
                pl.BlockSpec((K, H, C), lambda i: (0, 0, 0)),
                pl.BlockSpec((H, 1), lambda i: (0, 0)),
                pl.BlockSpec((C, H), lambda i: (0, 0)),
                pl.BlockSpec((C, 1), lambda i: (0, 0)),
                pl.BlockSpec((C, 1), lambda i: (0, 0)),
                pl.BlockSpec((C, 1), lambda i: (0, 0)),
            ],
            out_specs=pl.BlockSpec((batch_block, C, T_pad), lambda i: (i, 0, 0)),
        ),
        compiler_params=pltpu.CompilerParams(
            dimension_semantics=("parallel",),
            vmem_limit_bytes=int(vmem_limit_bytes)),
    )(x_in, m_in, w1_khc, b1_c, w2_ch, b2_c, g_c, bt_c)

    return out if T_pad == T else out[:, :, :T]


def ffn_layer_ref(x, mask, w1, b1, w2, b2, gamma, beta, K, eps, use_mxu):
    """Pure-JAX reference mirroring the kernel's dtype policy."""
    B, C, T = x.shape
    pad = K // 2
    xm = x * mask
    xp = jnp.pad(xm, ((0, 0), (0, 0), (pad, pad)))
    taps = [xp[:, :, k:k + T] for k in range(K)]          # tap_k[t] = xm[t+k-pad]
    if use_mxu:
        h = sum(jnp.einsum('hc,bct->bht',
                           w1[:, :, k].astype(jnp.bfloat16),
                           taps[k].astype(jnp.bfloat16),
                           preferred_element_type=jnp.float32)
                for k in range(K))
    else:
        h = sum(jnp.einsum('hc,bct->bht', w1[:, :, k], taps[k])
                for k in range(K))
    h = jnp.maximum(h + b1[None, :, None], 0.0)
    h = h * mask
    if use_mxu:
        y = jnp.einsum('ch,bht->bct', w2[:, :, 0].astype(jnp.bfloat16),
                       h.astype(jnp.bfloat16),
                       preferred_element_type=jnp.float32)
    else:
        y = jnp.einsum('ch,bht->bct', w2[:, :, 0], h)
    y = (y + b2[None, :, None]) * mask
    v = x + y
    mean = jnp.mean(v, axis=1, keepdims=True)
    centered = v - mean
    var = jnp.mean(centered * centered, axis=1, keepdims=True)
    z = centered * lax.rsqrt(var + eps) * gamma[None, :, None] + beta[None, :, None]
    return z * mask


def _make_params(key, channels, kernel_size, scale):
    hidden = channels * scale
    k1, k2, k3, k4, k5, k6 = jax.random.split(key, 6)
    w1 = jax.random.normal(k1, (hidden, channels, kernel_size), jnp.float32) * 0.1
    b1 = jax.random.normal(k2, (hidden,), jnp.float32) * 0.1
    w2 = jax.random.normal(k3, (channels, hidden, 1), jnp.float32) * 0.1
    b2 = jax.random.normal(k4, (channels,), jnp.float32) * 0.1
    gamma = 1.0 + 0.1 * jax.random.normal(k5, (channels,), jnp.float32)
    beta = 0.1 * jax.random.normal(k6, (channels,), jnp.float32)
    return w1, b1, w2, b2, gamma, beta


if __name__ == "__main__":
    eps = 1e-5
    key = jax.random.PRNGKey(0)

    # ---- test 1: module-scale shapes (tiny C/H -> VPU conv path) ----
    channels, kernel_size, scale = 4, 3, 4          # dropout=0.1 -> identity (eval)
    B, T = 2, 16
    kp, kx = jax.random.split(key)
    w1, b1, w2, b2, gamma, beta = _make_params(kp, channels, kernel_size, scale)
    x = jax.random.normal(kx, (B, channels, T), jnp.float32)
    mask = jnp.ones((B, 1, T), jnp.float32).at[1, 0, 12:].set(0.0)

    out = jax.block_until_ready(
        ffn_layer_pallas(x, mask, w1, b1, w2, b2, gamma, beta, kernel_size,
                         eps=eps))
    exp = ffn_layer_ref(x, mask, w1, b1, w2, b2, gamma, beta, kernel_size, eps,
                        use_mxu=False)
    assert out.shape == (B, channels, T)
    err = float(jnp.max(jnp.abs(out - exp)))
    assert err < 2e-3, "small-shape mismatch: max abs err = %g" % err

    # ---- test 2: larger channels (MXU conv path, bf16 operands / f32 acc) ----
    channels, kernel_size, scale = 64, 3, 4
    B, T = 2, 128
    kp, kx = jax.random.split(kx)
    w1, b1, w2, b2, gamma, beta = _make_params(kp, channels, kernel_size, scale)
    x = jax.random.normal(kx, (B, channels, T), jnp.float32)
    mask = jnp.ones((B, 1, T), jnp.float32).at[1, 0, 100:].set(0.0)

    out = jax.block_until_ready(
        ffn_layer_pallas(x, mask, w1, b1, w2, b2, gamma, beta, kernel_size,
                         eps=eps))
    exp = ffn_layer_ref(x, mask, w1, b1, w2, b2, gamma, beta, kernel_size, eps,
                        use_mxu=True)
    err = float(jnp.max(jnp.abs(out - exp)))
    assert err < 1e-2, "MXU-path mismatch: max abs err = %g" % err

    print("KERNEL_OK")
</pallas_src>

<mosaic_0001>
module attributes {stable_mosaic.version = 11 : i64} {
  func.func @_ffn_layer_kernel(%arg0: i32, %arg1: memref<1x4x128xf32, #tpu.memory_space<vmem>>, %arg2: memref<1x1x128xf32, #tpu.memory_space<vmem>>, %arg3: memref<3x16x4xf32, #tpu.memory_space<vmem>>, %arg4: memref<16x1xf32, #tpu.memory_space<vmem>>, %arg5: memref<4x16xf32, #tpu.memory_space<vmem>>, %arg6: memref<4x1xf32, #tpu.memory_space<vmem>>, %arg7: memref<4x1xf32, #tpu.memory_space<vmem>>, %arg8: memref<4x1xf32, #tpu.memory_space<vmem>>, %arg9: memref<1x4x128xf32, #tpu.memory_space<vmem>>) attributes {dimension_semantics = [#tpu.dimension_semantics<parallel>], iteration_bounds = array<i64: 2>, scalar_prefetch = 0 : i64, scratch_operands = 0 : i64, tpu.core_type = #tpu.core_type<tc>, window_params = [{transform_indices = @transform_0, window_bounds = array<i64: 1, 4, 128>}, {transform_indices = @transform_1, window_bounds = array<i64: 1, 1, 128>}, {pipeline_mode = #tpu.pipeline_mode<synchronous>, transform_indices = @transform_2, window_bounds = array<i64: 3, 16, 4>}, {pipeline_mode = #tpu.pipeline_mode<synchronous>, transform_indices = @transform_3, window_bounds = array<i64: 16, 1>}, {pipeline_mode = #tpu.pipeline_mode<synchronous>, transform_indices = @transform_4, window_bounds = array<i64: 4, 16>}, {pipeline_mode = #tpu.pipeline_mode<synchronous>, transform_indices = @transform_5, window_bounds = array<i64: 4, 1>}, {pipeline_mode = #tpu.pipeline_mode<synchronous>, transform_indices = @transform_6, window_bounds = array<i64: 4, 1>}, {pipeline_mode = #tpu.pipeline_mode<synchronous>, transform_indices = @transform_7, window_bounds = array<i64: 4, 1>}, {transform_indices = @transform_8, window_bounds = array<i64: 1, 4, 128>}]} {
    %c0 = arith.constant 0 : index
    %c0_0 = arith.constant 0 : index
    %c0_1 = arith.constant 0 : index
    %0 = vector.load %arg3[%c0, %c0_0, %c0_1] : memref<3x16x4xf32, #tpu.memory_space<vmem>>, vector<1x16x4xf32>
    %1 = vector.shape_cast %0 : vector<1x16x4xf32> to vector<16x4xf32>
    %c1 = arith.constant 1 : index
    %c0_2 = arith.constant 0 : index
    %c0_3 = arith.constant 0 : index
    %2 = vector.load %arg3[%c1, %c0_2, %c0_3] : memref<3x16x4xf32, #tpu.memory_space<vmem>>, vector<1x16x4xf32>
    %3 = vector.shape_cast %2 : vector<1x16x4xf32> to vector<16x4xf32>
    %c2 = arith.constant 2 : index
    %c0_4 = arith.constant 0 : index
    %c0_5 = arith.constant 0 : index
    %4 = vector.load %arg3[%c2, %c0_4, %c0_5] : memref<3x16x4xf32, #tpu.memory_space<vmem>>, vector<1x16x4xf32>
    %5 = vector.shape_cast %4 : vector<1x16x4xf32> to vector<16x4xf32>
    %c0_6 = arith.constant 0 : index
    %c0_7 = arith.constant 0 : index
    %6 = vector.load %arg5[%c0_6, %c0_7] : memref<4x16xf32, #tpu.memory_space<vmem>>, vector<4x16xf32>
    %c0_8 = arith.constant 0 : index
    %c0_9 = arith.constant 0 : index
    %7 = vector.load %arg4[%c0_8, %c0_9] : memref<16x1xf32, #tpu.memory_space<vmem>>, vector<16x1xf32>
    %c0_10 = arith.constant 0 : index
    %c0_11 = arith.constant 0 : index
    %8 = vector.load %arg6[%c0_10, %c0_11] : memref<4x1xf32, #tpu.memory_space<vmem>>, vector<4x1xf32>
    %c0_12 = arith.constant 0 : index
    %c0_13 = arith.constant 0 : index
    %9 = vector.load %arg7[%c0_12, %c0_13] : memref<4x1xf32, #tpu.memory_space<vmem>>, vector<4x1xf32>
    %c0_14 = arith.constant 0 : index
    %c0_15 = arith.constant 0 : index
    %10 = vector.load %arg8[%c0_14, %c0_15] : memref<4x1xf32, #tpu.memory_space<vmem>>, vector<4x1xf32>
    %11 = tpu.iota {dimensions = array<i32: 1>} : vector<1x128xi32>
    %c-1_i32 = arith.constant -1 : i32
    %12 = vector.broadcast %c-1_i32 : i32 to vector<1x128xi32>
    %13 = arith.addi %11, %12 : vector<1x128xi32>
    %c0_i32 = arith.constant 0 : i32
    %14 = vector.broadcast %c0_i32 : i32 to vector<1x128xi32>
    %15 = arith.cmpi sge, %13, %14 : vector<1x128xi32>
    %c-1_i32_16 = arith.constant -1 : i32
    %16 = vector.broadcast %c-1_i32_16 : i32 to vector<1x128xi32>
    %17 = arith.addi %11, %16 : vector<1x128xi32>
    %c128_i32 = arith.constant 128 : i32
    %18 = vector.broadcast %c128_i32 : i32 to vector<1x128xi32>
    %19 = arith.cmpi slt, %17, %18 : vector<1x128xi32>
    %20 = arith.andi %15, %19 : vector<1x128xi1>
    %21 = arith.extui %20 : vector<1x128xi1> to vector<1x128xi32>
    %22 = arith.sitofp %21 : vector<1x128xi32> to vector<1x128xf32>
    %c1_i32 = arith.constant 1 : i32
    %23 = vector.broadcast %c1_i32 : i32 to vector<1x128xi32>
    %24 = arith.addi %11, %23 : vector<1x128xi32>
    %c0_i32_17 = arith.constant 0 : i32
    %25 = vector.broadcast %c0_i32_17 : i32 to vector<1x128xi32>
    %26 = arith.cmpi sge, %24, %25 : vector<1x128xi32>
    %c1_i32_18 = arith.constant 1 : i32
    %27 = vector.broadcast %c1_i32_18 : i32 to vector<1x128xi32>
    %28 = arith.addi %11, %27 : vector<1x128xi32>
    %c128_i32_19 = arith.constant 128 : i32
    %29 = vector.broadcast %c128_i32_19 : i32 to vector<1x128xi32>
    %30 = arith.cmpi slt, %28, %29 : vector<1x128xi32>
    %31 = arith.andi %26, %30 : vector<1x128xi1>
    %32 = arith.extui %31 : vector<1x128xi1> to vector<1x128xi32>
    %33 = arith.sitofp %32 : vector<1x128xi32> to vector<1x128xf32>
    %c0_20 = arith.constant 0 : index
    %c0_21 = arith.constant 0 : index
    %c0_22 = arith.constant 0 : index
    %34 = vector.load %arg1[%c0_20, %c0_21, %c0_22] : memref<1x4x128xf32, #tpu.memory_space<vmem>>, vector<1x4x128xf32>
    %35 = vector.shape_cast %34 : vector<1x4x128xf32> to vector<4x128xf32>
    %c0_23 = arith.constant 0 : index
    %c0_24 = arith.constant 0 : index
    %c0_25 = arith.constant 0 : index
    %36 = vector.load %arg2[%c0_23, %c0_24, %c0_25] : memref<1x1x128xf32, #tpu.memory_space<vmem>>, vector<1x1x128xf32>
    %37 = vector.shape_cast %36 : vector<1x1x128xf32> to vector<1x128xf32>
    %38 = vector.broadcast %37 : vector<1x128xf32> to vector<4x128xf32>
    %39 = arith.mulf %35, %38 : vector<4x128xf32>
    %c1_i32_26 = arith.constant 1 : i32
    %40 = tpu.dynamic_rotate %39 by %c1_i32_26 dim 1 : vector<4x128xf32>, i32 -> vector<4x128xf32>
    %41 = vector.broadcast %22 : vector<1x128xf32> to vector<4x128xf32>
    %42 = arith.mulf %40, %41 : vector<4x128xf32>
    %c127_i32 = arith.constant 127 : i32
    %43 = tpu.dynamic_rotate %39 by %c127_i32 dim 1 : vector<4x128xf32>, i32 -> vector<4x128xf32>
    %44 = vector.broadcast %33 : vector<1x128xf32> to vector<4x128xf32>
    %45 = arith.mulf %43, %44 : vector<4x128xf32>
    %cst = arith.constant 0.000000e+00 : f32
    %46 = vector.broadcast %cst : f32 to vector<16x128xf32>
    %47 = vector.extract_strided_slice %1 {offsets = [0, 0], sizes = [16, 1], strides = [1, 1]} : vector<16x4xf32> to vector<16x1xf32>
    %48 = vector.extract_strided_slice %42 {offsets = [0, 0], sizes = [1, 128], strides = [1, 1]} : vector<4x128xf32> to vector<1x128xf32>
    %49 = vector.broadcast %47 : vector<16x1xf32> to vector<16x128xf32>
    %50 = vector.broadcast %48 : vector<1x128xf32> to vector<16x128xf32>
    %51 = arith.mulf %49, %50 : vector<16x128xf32>
    %52 = arith.addf %46, %51 : vector<16x128xf32>
    %53 = vector.extract_strided_slice %1 {offsets = [0, 1], sizes = [16, 1], strides = [1, 1]} : vector<16x4xf32> to vector<16x1xf32>
    %54 = vector.extract_strided_slice %42 {offsets = [1, 0], sizes = [1, 128], strides = [1, 1]} : vector<4x128xf32> to vector<1x128xf32>
    %55 = vector.broadcast %53 : vector<16x1xf32> to vector<16x128xf32>
    %56 = vector.broadcast %54 : vector<1x128xf32> to vector<16x128xf32>
    %57 = arith.mulf %55, %56 : vector<16x128xf32>
    %58 = arith.addf %52, %57 : vector<16x128xf32>
    %59 = vector.extract_strided_slice %1 {offsets = [0, 2], sizes = [16, 1], strides = [1, 1]} : vector<16x4xf32> to vector<16x1xf32>
    %60 = vector.extract_strided_slice %42 {offsets = [2, 0], sizes = [1, 128], strides = [1, 1]} : vector<4x128xf32> to vector<1x128xf32>
    %61 = vector.broadcast %59 : vector<16x1xf32> to vector<16x128xf32>
    %62 = vector.broadcast %60 : vector<1x128xf32> to vector<16x128xf32>
    %63 = arith.mulf %61, %62 : vector<16x128xf32>
    %64 = arith.addf %58, %63 : vector<16x128xf32>
    %65 = vector.extract_strided_slice %1 {offsets = [0, 3], sizes = [16, 1], strides = [1, 1]} : vector<16x4xf32> to vector<16x1xf32>
    %66 = vector.extract_strided_slice %42 {offsets = [3, 0], sizes = [1, 128], strides = [1, 1]} : vector<4x128xf32> to vector<1x128xf32>
    %67 = vector.broadcast %65 : vector<16x1xf32> to vector<16x128xf32>
    %68 = vector.broadcast %66 : vector<1x128xf32> to vector<16x128xf32>
    %69 = arith.mulf %67, %68 : vector<16x128xf32>
    %70 = arith.addf %64, %69 : vector<16x128xf32>
    %71 = vector.extract_strided_slice %3 {offsets = [0, 0], sizes = [16, 1], strides = [1, 1]} : vector<16x4xf32> to vector<16x1xf32>
    %72 = vector.extract_strided_slice %39 {offsets = [0, 0], sizes = [1, 128], strides = [1, 1]} : vector<4x128xf32> to vector<1x128xf32>
    %73 = vector.broadcast %71 : vector<16x1xf32> to vector<16x128xf32>
    %74 = vector.broadcast %72 : vector<1x128xf32> to vector<16x128xf32>
    %75 = arith.mulf %73, %74 : vector<16x128xf32>
    %76 = arith.addf %70, %75 : vector<16x128xf32>
    %77 = vector.extract_strided_slice %3 {offsets = [0, 1], sizes = [16, 1], strides = [1, 1]} : vector<16x4xf32> to vector<16x1xf32>
    %78 = vector.extract_strided_slice %39 {offsets = [1, 0], sizes = [1, 128], strides = [1, 1]} : vector<4x128xf32> to vector<1x128xf32>
    %79 = vector.broadcast %77 : vector<16x1xf32> to vector<16x128xf32>
    %80 = vector.broadcast %78 : vector<1x128xf32> to vector<16x128xf32>
    %81 = arith.mulf %79, %80 : vector<16x128xf32>
    %82 = arith.addf %76, %81 : vector<16x128xf32>
    %83 = vector.extract_strided_slice %3 {offsets = [0, 2], sizes = [16, 1], strides = [1, 1]} : vector<16x4xf32> to vector<16x1xf32>
    %84 = vector.extract_strided_slice %39 {offsets = [2, 0], sizes = [1, 128], strides = [1, 1]} : vector<4x128xf32> to vector<1x128xf32>
    %85 = vector.broadcast %83 : vector<16x1xf32> to vector<16x128xf32>
    %86 = vector.broadcast %84 : vector<1x128xf32> to vector<16x128xf32>
    %87 = arith.mulf %85, %86 : vector<16x128xf32>
    %88 = arith.addf %82, %87 : vector<16x128xf32>
    %89 = vector.extract_strided_slice %3 {offsets = [0, 3], sizes = [16, 1], strides = [1, 1]} : vector<16x4xf32> to vector<16x1xf32>
    %90 = vector.extract_strided_slice %39 {offsets = [3, 0], sizes = [1, 128], strides = [1, 1]} : vector<4x128xf32> to vector<1x128xf32>
    %91 = vector.broadcast %89 : vector<16x1xf32> to vector<16x128xf32>
    %92 = vector.broadcast %90 : vector<1x128xf32> to vector<16x128xf32>
    %93 = arith.mulf %91, %92 : vector<16x128xf32>
    %94 = arith.addf %88, %93 : vector<16x128xf32>
    %95 = vector.extract_strided_slice %5 {offsets = [0, 0], sizes = [16, 1], strides = [1, 1]} : vector<16x4xf32> to vector<16x1xf32>
    %96 = vector.extract_strided_slice %45 {offsets = [0, 0], sizes = [1, 128], strides = [1, 1]} : vector<4x128xf32> to vector<1x128xf32>
    %97 = vector.broadcast %95 : vector<16x1xf32> to vector<16x128xf32>
    %98 = vector.broadcast %96 : vector<1x128xf32> to vector<16x128xf32>
    %99 = arith.mulf %97, %98 : vector<16x128xf32>
    %100 = arith.addf %94, %99 : vector<16x128xf32>
    %101 = vector.extract_strided_slice %5 {offsets = [0, 1], sizes = [16, 1], strides = [1, 1]} : vector<16x4xf32> to vector<16x1xf32>
    %102 = vector.extract_strided_slice %45 {offsets = [1, 0], sizes = [1, 128], strides = [1, 1]} : vector<4x128xf32> to vector<1x128xf32>
    %103 = vector.broadcast %101 : vector<16x1xf32> to vector<16x128xf32>
    %104 = vector.broadcast %102 : vector<1x128xf32> to vector<16x128xf32>
    %105 = arith.mulf %103, %104 : vector<16x128xf32>
    %106 = arith.addf %100, %105 : vector<16x128xf32>
    %107 = vector.extract_strided_slice %5 {offsets = [0, 2], sizes = [16, 1], strides = [1, 1]} : vector<16x4xf32> to vector<16x1xf32>
    %108 = vector.extract_strided_slice %45 {offsets = [2, 0], sizes = [1, 128], strides = [1, 1]} : vector<4x128xf32> to vector<1x128xf32>
    %109 = vector.broadcast %107 : vector<16x1xf32> to vector<16x128xf32>
    %110 = vector.broadcast %108 : vector<1x128xf32> to vector<16x128xf32>
    %111 = arith.mulf %109, %110 : vector<16x128xf32>
    %112 = arith.addf %106, %111 : vector<16x128xf32>
    %113 = vector.extract_strided_slice %5 {offsets = [0, 3], sizes = [16, 1], strides = [1, 1]} : vector<16x4xf32> to vector<16x1xf32>
    %114 = vector.extract_strided_slice %45 {offsets = [3, 0], sizes = [1, 128], strides = [1, 1]} : vector<4x128xf32> to vector<1x128xf32>
    %115 = vector.broadcast %113 : vector<16x1xf32> to vector<16x128xf32>
    %116 = vector.broadcast %114 : vector<1x128xf32> to vector<16x128xf32>
    %117 = arith.mulf %115, %116 : vector<16x128xf32>
    %118 = arith.addf %112, %117 : vector<16x128xf32>
    %119 = vector.broadcast %7 : vector<16x1xf32> to vector<16x128xf32>
    %120 = arith.addf %118, %119 : vector<16x128xf32>
    %cst_27 = arith.constant 0.000000e+00 : f32
    %121 = vector.broadcast %cst_27 : f32 to vector<16x128xf32>
    %122 = arith.maximumf %120, %121 : vector<16x128xf32>
    %123 = vector.broadcast %37 : vector<1x128xf32> to vector<16x128xf32>
    %124 = arith.mulf %122, %123 : vector<16x128xf32>
    %cst_28 = arith.constant 0.000000e+00 : f32
    %125 = vector.broadcast %cst_28 : f32 to vector<4x128xf32>
    %126 = vector.extract_strided_slice %6 {offsets = [0, 0], sizes = [4, 1], strides = [1, 1]} : vector<4x16xf32> to vector<4x1xf32>
    %127 = vector.extract_strided_slice %124 {offsets = [0, 0], sizes = [1, 128], strides = [1, 1]} : vector<16x128xf32> to vector<1x128xf32>
    %128 = vector.broadcast %126 : vector<4x1xf32> to vector<4x128xf32>
    %129 = vector.broadcast %127 : vector<1x128xf32> to vector<4x128xf32>
    %130 = arith.mulf %128, %129 : vector<4x128xf32>
    %131 = arith.addf %125, %130 : vector<4x128xf32>
    %132 = vector.extract_strided_slice %6 {offsets = [0, 1], sizes = [4, 1], strides = [1, 1]} : vector<4x16xf32> to vector<4x1xf32>
    %133 = vector.extract_strided_slice %124 {offsets = [1, 0], sizes = [1, 128], strides = [1, 1]} : vector<16x128xf32> to vector<1x128xf32>
    %134 = vector.broadcast %132 : vector<4x1xf32> to vector<4x128xf32>
    %135 = vector.broadcast %133 : vector<1x128xf32> to vector<4x128xf32>
    %136 = arith.mulf %134, %135 : vector<4x128xf32>
    %137 = arith.addf %131, %136 : vector<4x128xf32>
    %138 = vector.extract_strided_slice %6 {offsets = [0, 2], sizes = [4, 1], strides = [1, 1]} : vector<4x16xf32> to vector<4x1xf32>
    %139 = vector.extract_strided_slice %124 {offsets = [2, 0], sizes = [1, 128], strides = [1, 1]} : vector<16x128xf32> to vector<1x128xf32>
    %140 = vector.broadcast %138 : vector<4x1xf32> to vector<4x128xf32>
    %141 = vector.broadcast %139 : vector<1x128xf32> to vector<4x128xf32>
    %142 = arith.mulf %140, %141 : vector<4x128xf32>
    %143 = arith.addf %137, %142 : vector<4x128xf32>
    %144 = vector.extract_strided_slice %6 {offsets = [0, 3], sizes = [4, 1], strides = [1, 1]} : vector<4x16xf32> to vector<4x1xf32>
    %145 = vector.extract_strided_slice %124 {offsets = [3, 0], sizes = [1, 128], strides = [1, 1]} : vector<16x128xf32> to vector<1x128xf32>
    %146 = vector.broadcast %144 : vector<4x1xf32> to vector<4x128xf32>
    %147 = vector.broadcast %145 : vector<1x128xf32> to vector<4x128xf32>
    %148 = arith.mulf %146, %147 : vector<4x128xf32>
    %149 = arith.addf %143, %148 : vector<4x128xf32>
    %150 = vector.extract_strided_slice %6 {offsets = [0, 4], sizes = [4, 1], strides = [1, 1]} : vector<4x16xf32> to vector<4x1xf32>
    %151 = vector.extract_strided_slice %124 {offsets = [4, 0], sizes = [1, 128], strides = [1, 1]} : vector<16x128xf32> to vector<1x128xf32>
    %152 = vector.broadcast %150 : vector<4x1xf32> to vector<4x128xf32>
    %153 = vector.broadcast %151 : vector<1x128xf32> to vector<4x128xf32>
    %154 = arith.mulf %152, %153 : vector<4x128xf32>
    %155 = arith.addf %149, %154 : vector<4x128xf32>
    %156 = vector.extract_strided_slice %6 {offsets = [0, 5], sizes = [4, 1], strides = [1, 1]} : vector<4x16xf32> to vector<4x1xf32>
    %157 = vector.extract_strided_slice %124 {offsets = [5, 0], sizes = [1, 128], strides = [1, 1]} : vector<16x128xf32> to vector<1x128xf32>
    %158 = vector.broadcast %156 : vector<4x1xf32> to vector<4x128xf32>
    %159 = vector.broadcast %157 : vector<1x128xf32> to vector<4x128xf32>
    %160 = arith.mulf %158, %159 : vector<4x128xf32>
    %161 = arith.addf %155, %160 : vector<4x128xf32>
    %162 = vector.extract_strided_slice %6 {offsets = [0, 6], sizes = [4, 1], strides = [1, 1]} : vector<4x16xf32> to vector<4x1xf32>
    %163 = vector.extract_strided_slice %124 {offsets = [6, 0], sizes = [1, 128], strides = [1, 1]} : vector<16x128xf32> to vector<1x128xf32>
    %164 = vector.broadcast %162 : vector<4x1xf32> to vector<4x128xf32>
    %165 = vector.broadcast %163 : vector<1x128xf32> to vector<4x128xf32>
    %166 = arith.mulf %164, %165 : vector<4x128xf32>
    %167 = arith.addf %161, %166 : vector<4x128xf32>
    %168 = vector.extract_strided_slice %6 {offsets = [0, 7], sizes = [4, 1], strides = [1, 1]} : vector<4x16xf32> to vector<4x1xf32>
    %169 = vector.extract_strided_slice %124 {offsets = [7, 0], sizes = [1, 128], strides = [1, 1]} : vector<16x128xf32> to vector<1x128xf32>
    %170 = vector.broadcast %168 : vector<4x1xf32> to vector<4x128xf32>
    %171 = vector.broadcast %169 : vector<1x128xf32> to vector<4x128xf32>
    %172 = arith.mulf %170, %171 : vector<4x128xf32>
    %173 = arith.addf %167, %172 : vector<4x128xf32>
    %174 = vector.extract_strided_slice %6 {offsets = [0, 8], sizes = [4, 1], strides = [1, 1]} : vector<4x16xf32> to vector<4x1xf32>
    %175 = vector.extract_strided_slice %124 {offsets = [8, 0], sizes = [1, 128], strides = [1, 1]} : vector<16x128xf32> to vector<1x128xf32>
    %176 = vector.broadcast %174 : vector<4x1xf32> to vector<4x128xf32>
    %177 = vector.broadcast %175 : vector<1x128xf32> to vector<4x128xf32>
    %178 = arith.mulf %176, %177 : vector<4x128xf32>
    %179 = arith.addf %173, %178 : vector<4x128xf32>
    %180 = vector.extract_strided_slice %6 {offsets = [0, 9], sizes = [4, 1], strides = [1, 1]} : vector<4x16xf32> to vector<4x1xf32>
    %181 = vector.extract_strided_slice %124 {offsets = [9, 0], sizes = [1, 128], strides = [1, 1]} : vector<16x128xf32> to vector<1x128xf32>
    %182 = vector.broadcast %180 : vector<4x1xf32> to vector<4x128xf32>
    %183 = vector.broadcast %181 : vector<1x128xf32> to vector<4x128xf32>
    %184 = arith.mulf %182, %183 : vector<4x128xf32>
    %185 = arith.addf %179, %184 : vector<4x128xf32>
    %186 = vector.extract_strided_slice %6 {offsets = [0, 10], sizes = [4, 1], strides = [1, 1]} : vector<4x16xf32> to vector<4x1xf32>
    %187 = vector.extract_strided_slice %124 {offsets = [10, 0], sizes = [1, 128], strides = [1, 1]} : vector<16x128xf32> to vector<1x128xf32>
    %188 = vector.broadcast %186 : vector<4x1xf32> to vector<4x128xf32>
    %189 = vector.broadcast %187 : vector<1x128xf32> to vector<4x128xf32>
    %190 = arith.mulf %188, %189 : vector<4x128xf32>
    %191 = arith.addf %185, %190 : vector<4x128xf32>
    %192 = vector.extract_strided_slice %6 {offsets = [0, 11], sizes = [4, 1], strides = [1, 1]} : vector<4x16xf32> to vector<4x1xf32>
    %193 = vector.extract_strided_slice %124 {offsets = [11, 0], sizes = [1, 128], strides = [1, 1]} : vector<16x128xf32> to vector<1x128xf32>
    %194 = vector.broadcast %192 : vector<4x1xf32> to vector<4x128xf32>
    %195 = vector.broadcast %193 : vector<1x128xf32> to vector<4x128xf32>
    %196 = arith.mulf %194, %195 : vector<4x128xf32>
    %197 = arith.addf %191, %196 : vector<4x128xf32>
    %198 = vector.extract_strided_slice %6 {offsets = [0, 12], sizes = [4, 1], strides = [1, 1]} : vector<4x16xf32> to vector<4x1xf32>
    %199 = vector.extract_strided_slice %124 {offsets = [12, 0], sizes = [1, 128], strides = [1, 1]} : vector<16x128xf32> to vector<1x128xf32>
    %200 = vector.broadcast %198 : vector<4x1xf32> to vector<4x128xf32>
    %201 = vector.broadcast %199 : vector<1x128xf32> to vector<4x128xf32>
    %202 = arith.mulf %200, %201 : vector<4x128xf32>
    %203 = arith.addf %197, %202 : vector<4x128xf32>
    %204 = vector.extract_strided_slice %6 {offsets = [0, 13], sizes = [4, 1], strides = [1, 1]} : vector<4x16xf32> to vector<4x1xf32>
    %205 = vector.extract_strided_slice %124 {offsets = [13, 0], sizes = [1, 128], strides = [1, 1]} : vector<16x128xf32> to vector<1x128xf32>
    %206 = vector.broadcast %204 : vector<4x1xf32> to vector<4x128xf32>
    %207 = vector.broadcast %205 : vector<1x128xf32> to vector<4x128xf32>
    %208 = arith.mulf %206, %207 : vector<4x128xf32>
    %209 = arith.addf %203, %208 : vector<4x128xf32>
    %210 = vector.extract_strided_slice %6 {offsets = [0, 14], sizes = [4, 1], strides = [1, 1]} : vector<4x16xf32> to vector<4x1xf32>
    %211 = vector.extract_strided_slice %124 {offsets = [14, 0], sizes = [1, 128], strides = [1, 1]} : vector<16x128xf32> to vector<1x128xf32>
    %212 = vector.broadcast %210 : vector<4x1xf32> to vector<4x128xf32>
    %213 = vector.broadcast %211 : vector<1x128xf32> to vector<4x128xf32>
    %214 = arith.mulf %212, %213 : vector<4x128xf32>
    %215 = arith.addf %209, %214 : vector<4x128xf32>
    %216 = vector.extract_strided_slice %6 {offsets = [0, 15], sizes = [4, 1], strides = [1, 1]} : vector<4x16xf32> to vector<4x1xf32>
    %217 = vector.extract_strided_slice %124 {offsets = [15, 0], sizes = [1, 128], strides = [1, 1]} : vector<16x128xf32> to vector<1x128xf32>
    %218 = vector.broadcast %216 : vector<4x1xf32> to vector<4x128xf32>
    %219 = vector.broadcast %217 : vector<1x128xf32> to vector<4x128xf32>
    %220 = arith.mulf %218, %219 : vector<4x128xf32>
    %221 = arith.addf %215, %220 : vector<4x128xf32>
    %222 = vector.broadcast %8 : vector<4x1xf32> to vector<4x128xf32>
    %223 = arith.addf %221, %222 : vector<4x128xf32>
    %224 = vector.broadcast %37 : vector<1x128xf32> to vector<4x128xf32>
    %225 = arith.mulf %223, %224 : vector<4x128xf32>
    %226 = arith.addf %35, %225 : vector<4x128xf32>
    %cst_29 = arith.constant dense<0.000000e+00> : vector<128xf32>
    %227 = vector.multi_reduction <add>, %226, %cst_29 [0] : vector<4x128xf32> to vector<128xf32>
    %228 = vector.shape_cast %227 : vector<128xf32> to vector<1x128xf32>
    %cst_30 = arith.constant 4.000000e+00 : f32
    %229 = vector.broadcast %cst_30 : f32 to vector<1x128xf32>
    %230 = arith.divf %228, %229 : vector<1x128xf32>
    %231 = vector.broadcast %230 : vector<1x128xf32> to vector<4x128xf32>
    %232 = arith.subf %226, %231 : vector<4x128xf32>
    %233 = arith.mulf %232, %232 : vector<4x128xf32>
    %cst_31 = arith.constant dense<0.000000e+00> : vector<128xf32>
    %234 = vector.multi_reduction <add>, %233, %cst_31 [0] : vector<4x128xf32> to vector<128xf32>
    %235 = vector.shape_cast %234 : vector<128xf32> to vector<1x128xf32>
    %cst_32 = arith.constant 4.000000e+00 : f32
    %236 = vector.broadcast %cst_32 : f32 to vector<1x128xf32>
    %237 = arith.divf %235, %236 : vector<1x128xf32>
    %cst_33 = arith.constant 9.99999974E-6 : f32
    %238 = vector.broadcast %cst_33 : f32 to vector<1x128xf32>
    %239 = arith.addf %237, %238 : vector<1x128xf32>
    %240 = math.rsqrt %239 : vector<1x128xf32>
    %241 = vector.broadcast %240 : vector<1x128xf32> to vector<4x128xf32>
    %242 = arith.mulf %232, %241 : vector<4x128xf32>
    %243 = vector.broadcast %9 : vector<4x1xf32> to vector<4x128xf32>
    %244 = arith.mulf %242, %243 : vector<4x128xf32>
    %245 = vector.broadcast %10 : vector<4x1xf32> to vector<4x128xf32>
    %246 = arith.addf %244, %245 : vector<4x128xf32>
    %247 = vector.broadcast %37 : vector<1x128xf32> to vector<4x128xf32>
    %248 = arith.mulf %246, %247 : vector<4x128xf32>
    %c0_34 = arith.constant 0 : index
    %c0_35 = arith.constant 0 : index
    %c0_36 = arith.constant 0 : index
    %249 = vector.load %arg9[%c0_34, %c0_35, %c0_36] : memref<1x4x128xf32, #tpu.memory_space<vmem>>, vector<1x4x128xf32>
    %250 = vector.shape_cast %249 : vector<1x4x128xf32> to vector<4x128xf32>
    %251 = vector.shape_cast %248 : vector<4x128xf32> to vector<1x4x128xf32>
    tpu.vector_store %arg9[%c0_34, %c0_35, %c0_36], %251 {strides = array<i32>} : memref<1x4x128xf32, #tpu.memory_space<vmem>>, vector<1x4x128xf32>,
    return
  }
  func.func @transform_0(%arg0: i32) -> (i32, i32, i32) {
    %c0_i32 = arith.constant 0 : i32
    %c0_i32_0 = arith.constant 0 : i32
    %c0_i32_1 = arith.constant 0 : i32
    return %arg0, %c0_i32, %c0_i32_0 : i32, i32, i32
  }
  func.func @transform_1(%arg0: i32) -> (i32, i32, i32) {
    %c0_i32 = arith.constant 0 : i32
    %c0_i32_0 = arith.constant 0 : i32
    %c0_i32_1 = arith.constant 0 : i32
    return %arg0, %c0_i32, %c0_i32_0 : i32, i32, i32
  }
  func.func @transform_2(%arg0: i32) -> (i32, i32, i32) {
    %c0_i32 = arith.constant 0 : i32
    %c0_i32_0 = arith.constant 0 : i32
    %c0_i32_1 = arith.constant 0 : i32
    %c0_i32_2 = arith.constant 0 : i32
    return %c0_i32, %c0_i32_0, %c0_i32_1 : i32, i32, i32
  }
  func.func @transform_3(%arg0: i32) -> (i32, i32) {
    %c0_i32 = arith.constant 0 : i32
    %c0_i32_0 = arith.constant 0 : i32
    %c0_i32_1 = arith.constant 0 : i32
    return %c0_i32, %c0_i32_0 : i32, i32
  }
  func.func @transform_4(%arg0: i32) -> (i32, i32) {
    %c0_i32 = arith.constant 0 : i32
    %c0_i32_0 = arith.constant 0 : i32
    %c0_i32_1 = arith.constant 0 : i32
    return %c0_i32, %c0_i32_0 : i32, i32
  }
  func.func @transform_5(%arg0: i32) -> (i32, i32) {
    %c0_i32 = arith.constant 0 : i32
    %c0_i32_0 = arith.constant 0 : i32
    %c0_i32_1 = arith.constant 0 : i32
    return %c0_i32, %c0_i32_0 : i32, i32
  }
  func.func @transform_6(%arg0: i32) -> (i32, i32) {
    %c0_i32 = arith.constant 0 : i32
    %c0_i32_0 = arith.constant 0 : i32
    %c0_i32_1 = arith.constant 0 : i32
    return %c0_i32, %c0_i32_0 : i32, i32
  }
  func.func @transform_7(%arg0: i32) -> (i32, i32) {
    %c0_i32 = arith.constant 0 : i32
    %c0_i32_0 = arith.constant 0 : i32
    %c0_i32_1 = arith.constant 0 : i32
    return %c0_i32, %c0_i32_0 : i32, i32
  }
  func.func @transform_8(%arg0: i32) -> (i32, i32, i32) {
    %c0_i32 = arith.constant 0 : i32
    %c0_i32_0 = arith.constant 0 : i32
    %c0_i32_1 = arith.constant 0 : i32
    return %arg0, %c0_i32, %c0_i32_0 : i32, i32, i32
  }
}

</mosaic_0001>

<bundles_post_ra>
// kernel: tpu_custom_call.1
= control target key start
LH: loop header
LB: loop body
LE: loop exit
PB: predicated region body
PF: predicated region fallthrough
CT: control target
= control target key end

     0   :  { %13 = vsyncpa [#allocation3], 0  ;;  %s1318_s0 = inlined_call_operand.vmem [shape: f32[2,4,128], index: 0, kind: input, shape index: {}]   ;;  %s1319_s1 = inlined_call_operand.vmem [shape: f32[2,1,128], index: 1, kind: input, shape index: {}]   ;;  %s1320_s2 = inlined_call_operand.vmem [shape: f32[3,16,4], index: 2, kind: input, shape index: {}]   ;;  %s1321_s3 = inlined_call_operand.vmem [shape: f32[16,1], index: 3, kind: input, shape index: {}]   ;;  %s1322_s4 = inlined_call_operand.vmem [shape: f32[4,16], index: 4, kind: input, shape index: {}]   ;;  %s1323_s5 = inlined_call_operand.vmem [shape: f32[4,1], index: 5, kind: input, shape index: {}]   ;;  %s1324_s6 = inlined_call_operand.vmem [shape: f32[4,1], index: 6, kind: input, shape index: {}]   ;;  %s1325_s7 = inlined_call_operand.vmem [shape: f32[4,1], index: 7, kind: input, shape index: {}]   ;;  %s1326_s8 = inlined_call_operand.hbm [shape: f32[2,4,128], index: 8, kind: output, shape index: {}]  }
   0x1   :  { %15 = vsyncpa [#allocation3 + $0x1], 0  ;;  %s1103_s27 = smov 0   ;;  %s1105_s28 = smov 0  }
   0x2   :  { %s1107_s29 = smov 0   ;;  %s1109_s30 = smov 0  }
   0x3 LB: > { %s1124_s9 = sadd.s32 4294967295, %s1036_s30   ;;  %s860_s10 = sadd.s32 4294967294, %s1036_s30   ;;  %s1036_s30 = sphi %s1109_s30, %s1332_s30   ;;  %s1032_s29 = sphi %s1107_s29, %s1331_s29   ;;  %s1028_s28 = sphi %s1105_s28, %s1330_s28   ;;  %s1024_s27 = sphi %s1103_s27, %s1329_s27  }
   0x4   : > { %s1128_s11 = sadd.s32 1, %s1036_s30   ;;  %s206_s12 = sadd.s32 1, %s1032_s29 }
   0x5   : > { %s203_s13 = ssub.s32 %s1036_s30, %s1128_s11  ;;  %p216_p0 = scmp.ne.s32.totalorder %s1032_s29, %s1028_s28 }
   0x6   : > { %p204_p1 = scmp.eq.s32.totalorder %s203_s13, 0  ;;  %p217_p2 = scmp.eq.s32.totalorder %s1124_s9, 1 }
   0x7   : > { %p222_p3 = scmp.ne.s32.totalorder %s1028_s28, %s1024_s27  ;;  %p223_p4 = scmp.eq.s32.totalorder %s860_s10, 1 }
   0x8   : > { %s1139_s14 = scalar_select %p204_p1, %s1032_s29, %s206_s12  }
   0x9   : > { %p1141_p5 = por %p217_p2, %p216_p0  ;;  %p1145_p6 = por %p223_p4, %p222_p3 }
   0xa   : > { %p863_p7 = scmp.ge.s32.totalorder %s1036_s30, 1  ;;  %p272_p8 = scmp.lt.s32.totalorder %s1036_s30, 3 }
   0xc   : > { %p273_p9 = pnand %p863_p7, %p272_p8 }
   0xd   : > { %v315_v0 = vld [vmem:[%s1320_s2] sm:$0xff] (!%p273_p9)  ;;  %v1038_v1 = vmov (!%p273_p9), 2   ;;  %v1039_v2 = vmov (!%p273_p9), 0   ;;  %p308_p10 = scmp.lt.s32.totalorder (!%p273_p9), %s1124_s9, 1  ;;  %v866_v3 = vld [vmem:[%s1320_s2 + $0x10] sm:$0xff] (!%p273_p9)  ;;  %v1040_v4 = vmov (!%p273_p9), 3   ;;  %v329_v34 = vlaneseq (!%p273_p9) }
   0xe   : > { %276 = sbr.rel (%p273_p9) target bundleno = 360 (0x168), region = 52  ;;  %936 = vset.pattern.permute.xlu1 (!%p273_p9), %v1038_v1  ;;  %935 = vset.pattern.permute.xlu0 (!%p273_p9), %v1039_v2  ;;  %v868_v6 = vld [vmem:[%s1320_s2 + $0x20] sm:$0xff] (!%p273_p9)  ;;  %s1041_s18 = smov (!%p273_p9), 1   ;;  %v1042_v9 = vmov (!%p273_p9), 1   ;;  %v867_v10 = vld [vmem:[%s1320_s2 + $0x18] sm:$0xff] (!%p273_p9)  ;;  %v316_v11 = vld [vmem:[%s1320_s2 + $0x8] sm:$0xff] (!%p273_p9) }
   0xf   : > { %393 = vperm.xlu1 (!%p273_p9), %936, %v315_v0   ;;  %360 = vperm.xlu0 (!%p273_p9), %935, %v315_v0   ;;  %s1043_s19 = smov (!%p273_p9), 127   ;;  %v869_v12 = vld [vmem:[%s1320_s2 + $0x28] sm:$0xff] (!%p273_p9)  ;;  %v323_v14 = vld [vmem:[%s1322_s4] sm:$0xf] (!%p273_p9)  ;;  %v1044_v15 = vmov (!%p273_p9), 6   ;;  %v1045_v16 = vmov (!%p273_p9), 9  }
  0x10   : > { %v325_v13 = vld [vmem:[%s1321_s3 + $0x8] sm:$0xff] (!%p273_p9)  ;;  %v324_v17 = vld [vmem:[%s1321_s3] sm:$0xff] (!%p273_p9)  ;;  %v1046_v18 = vmov (!%p273_p9), 12   ;;  %v1047_v19 = vmov (!%p273_p9), 15   ;;  %v1048_v21 = vmov (!%p273_p9), 4   ;;  %v1049_v22 = vmov (!%p273_p9), 5  }
  0x11   : > { %v328_v20 = vld [vmem:[%s1325_s7] sm:$0xf] (!%p273_p9)  ;;  %v1050_v23 = vmov (!%p273_p9), 7   ;;  %v1051_v24 = vmov (!%p273_p9), 8   ;;  %v1052_v25 = vmov (!%p273_p9), 10   ;;  %v1053_v26 = vmov (!%p273_p9), 11  }
  0x12   : > { %v1054_v27 = vmov (!%p273_p9), 13   ;;  %v1055_v29 = vmov (!%p273_p9), 14   ;;  %v326_v31 = vld [vmem:[%s1323_s5] sm:$0xf] (!%p273_p9)  ;;  %v330_v37 = vand.u32 (!%p273_p9), 127, %v329_v34  ;;  %v1224_v43 = vshrl.u32 (!%p273_p9), %v329_v34, 7 }
  0x13   : > { %937 = vset.pattern.permute.xlu1 (!%p273_p9), %v1040_v4  ;;  %426 = vperm.xlu0 (!%p273_p9), %935, %v866_v3   ;;  %v327_v35 = vld [vmem:[%s1324_s6] sm:$0xf] (!%p273_p9)  ;;  %v1056_v44 = vmov (!%p273_p9), 0.0   ;;  %vm741_vm2 = vcmask (!%p273_p9), 1043456   ;;  %s874_s10 = sshll.u32 (!%p273_p9), %s1124_s9, 6 }
  0x14   : > { %409 = vperm.xlu1 (!%p273_p9), %937, %v315_v0   ;;  %v331_v40 = vadd.s32 (!%p273_p9), 4294967295, %v330_v37  ;;  %v1227_v48 = vsub.s32 (!%p273_p9), 0, %v1224_v43  ;;  %v1230_v50 = vsub.s32 (!%p273_p9), 1, %v1224_v43  ;;  %v1235_v55 = vsub.s32 (!%p273_p9), 2, %v1224_v43 }
  0x15   : > { %s309_s21 = scalar_select %p308_p10, %s1124_s9, 1  ;;  %v1238_v60 = vsub.s32 3, %v1224_v43 }
  0x16   : > { %vm332_vm0 = vcmp.ge.s32.totalorder %v331_v40, 0  ;;  %s1057_s9 = smov [#allocation2]  }
  0x17   : > { %s865_s22 = sshll.u32 %s309_s21, 2  ;;  %s314_s25 = scalar_lea.vmem %s1319_s1, %s309_s21  ;;  %492 = vperm.xlu0 %935, %v868_v6   ;;  %v870_v45 = vsel %vm332_vm0, 1.0, %v1056_v44 }
  0x18   : > { %s311_s12 = scalar_lea.vmem %s1318_s0, %s865_s22  ;;  %v1168_v5 = vld [vmem:[%s314_s25] ss:$0 sm:$0xff]  ;;  %938 = vset.pattern.permute.xlu1 %v1042_v9  ;;  %s305_s25 = sand.u32 1, %s1028_s28  }
  0x19   : > { %v1173_v7 = vld [vmem:[%s311_s12] sm:$0xf]  ;;  %s864_s26 = sshll.u32 %s305_s25, 2  ;;  %s779_s20 = scalar_lea.sflag [#allocation3], %s305_s25 }
  0x1a   : > { %v1177_v8 = vmul.f32 %v1168_v5, %v1173_v7  ;;  %s307_s12 = scalar_lea.vmem [#allocation2], %s864_s26  ;;  %s978_s22 = sshll.u32 %s1057_s9, 4  ;;  %s979_s22 = int_to_ptr.vmem [resolvable:$false] %s978_s22 }
  0x1b   : > { %942 = vset.pattern.permute.xlu0 %v1042_v9  ;;  %s792_s13 = sshll.u32 %s307_s12, 4  ;;  %s980_s23 = scalar_lea.vmem %s979_s22, 128  ;;  %s1278_s13 = int_to_ptr.vmem [resolvable:$true] %s792_s13 }
  0x1c   : > { %352 = vrot.lane.b32.xlu1 %v1177_v8, %s1041_s18  ;;  %377 = vperm.xlu0 %942, %v315_v0   ;;  %s974_s21 = scalar_lea.vmem %s1278_s13, 64  ;;  %p981_p0 = scmp.lt.s32.totalorder %s1278_s13, %s979_s22 }
  0x1d   : > { %p975_p11 = scmp.ne.s32.totalorder %s1278_s13, %s974_s21  ;;  %p982_p1 = scmp.lt.s32.totalorder %s980_s23, %s974_s21 }
  0x1f   : > { %p976_p12 = pnand %p975_p11, %p1141_p5  ;;  %p983_p2 = por %p982_p1, %p981_p0 }
  0x20   : > { %443 = vperm.xlu1 %938, %v866_v3   ;;  %355 = vrot.lane.b32.xlu0 %v1177_v8, %s1043_s19  ;;  %s1276_s19 = scalar_lea.hbm %s1326_s8, %s874_s10 }
  0x21   : > { %p977_p13 = pneg %p976_p12 }
  0x23   : > { %p984_p3 = pnand %p983_p2, %p977_p13 }
  0x24   : > { %939 = vset.pattern.permute.xlu1 %v1038_v1  ;;  %447 = vperm.xlu0 %942, %v867_v10  }
  0x25   : > { %459 = vperm.xlu1 %939, %v866_v3  }
  0x28   : > { %948 = vset.pattern.permute.xlu0 %v1038_v1 }
  0x29   : > { %940 = vset.pattern.permute.xlu1 %v1039_v2  ;;  %525 = vperm.xlu0 %948, %v868_v6  }
  0x2a   : > { %365 = vperm.xlu1 %940, %v316_v11  }
  0x2d   : > { %529 = vperm.xlu0 %948, %v869_v12  }
  0x2e   : > { %941 = vset.pattern.permute.xlu1 %v1042_v9 }
  0x2f   : > { %381 = vperm.xlu1 %941, %v316_v11  }
  0x31   : > { %952 = vset.pattern.permute.xlu0 %v1040_v4 }
  0x32   : > { %475 = vperm.xlu0 %952, %v866_v3   ;;  %v437_v3 = vrot.slane %v1177_v8, %v1227_v48 }
  0x33   : > { %943 = vset.pattern.permute.xlu1 %v1038_v1 }
  0x34   : > { %397 = vperm.xlu1 %943, %v316_v11  }
  0x36   : > { %479 = vperm.xlu0 %952, %v867_v10  }
  0x38   : > { %944 = vset.pattern.permute.xlu1 %v1042_v9 }
  0x39   : > { %509 = vperm.xlu1 %944, %v868_v6  }
  0x3a   : > { %545 = vperm.xlu0 %952, %v869_v12  }
  0x3d   : > { %945 = vset.pattern.permute.xlu1 %v1040_v4 }
  0x3e   : > { %413 = vperm.xlu1 %945, %v316_v11   ;;  %957 = vset.pattern.permute.xlu0 %v1039_v2 }
  0x3f   : > { %563 = vperm.xlu0 %957, %v325_v13  }
  0x42   : > { %946 = vset.pattern.permute.xlu1 %v1039_v2 }
  0x43   : > { %431 = vperm.xlu1 %946, %v867_v10   ;;  %960 = vset.pattern.permute.xlu0 %v1044_v15 }
  0x44   : > { %634 = vperm.xlu0 %960, %v323_v14  }
  0x47   : > { %947 = vset.pattern.permute.xlu1 %v1040_v4 }
  0x48   : > { %541 = vperm.xlu1 %947, %v868_v6   ;;  %963 = vset.pattern.permute.xlu0 %v1045_v16  ;;  %v337_v6 = vadd.s32 1, %v330_v37 }
  0x49   : > { %664 = vperm.xlu0 %963, %v323_v14  }
  0x4a   : > { %vm339_vm1 = vcmp.lt.s32.totalorder %v337_v6, 128 }
  0x4b   : > { %v871_v15 = vsel %vm339_vm1, 1.0, %v1056_v44 }
  0x4c   : > { %949 = vset.pattern.permute.xlu1 %v1038_v1 }
  0x4d   : > { %463 = vperm.xlu1 %949, %v867_v10   ;;  %966 = vset.pattern.permute.xlu0 %v1046_v18 }
  0x4e   : > { %694 = vperm.xlu0 %966, %v323_v14  }
  0x51   : > { %950 = vset.pattern.permute.xlu1 %v1039_v2 }
  0x52   : > { %558 = vperm.xlu1 %950, %v324_v17   ;;  %969 = vset.pattern.permute.xlu0 %v1047_v19  ;;  %v469_v19 = vrot.slane %v1177_v8, %v1235_v55 }
  0x53   : > { %724 = vperm.xlu0 %969, %v323_v14  }
  0x56   : > { %497 = vperm.xlu1 %950, %v869_v12  }
  0x57   : > { %971 = vset.pattern.permute.xlu0 %v1039_v2 }
  0x58   : > { %772 = vperm.xlu0 %971, %v328_v20  }
  0x5a   : > { %951 = vset.pattern.permute.xlu1 %v1042_v9 }
  0x5b   : > { %513 = vperm.xlu1 %951, %v869_v12  }
  0x5f   : > { %953 = vset.pattern.permute.xlu1 %v1039_v2 }
  0x60   : > { %574 = vperm.xlu1 %953, %v323_v14  }
  0x64   : > { %954 = vset.pattern.permute.xlu1 %v1042_v9 }
  0x65   : > { %584 = vperm.xlu1 %954, %v323_v14  }
  0x69   : > { %955 = vset.pattern.permute.xlu1 %v1038_v1 }
  0x6a   : > { %594 = vperm.xlu1 %955, %v323_v14  }
  0x6e   : > { %956 = vset.pattern.permute.xlu1 %v1040_v4 }
  0x6f   : > { %604 = vperm.xlu1 %956, %v323_v14  }
  0x73   : > { %958 = vset.pattern.permute.xlu1 %v1048_v21  ;;  %v485_v21 = vrot.slane %v1177_v8, %v1238_v60 }
  0x74   : > { %614 = vperm.xlu1 %958, %v323_v14  }
  0x78   : > { %959 = vset.pattern.permute.xlu1 %v1049_v22 }
  0x79   : > { %624 = vperm.xlu1 %959, %v323_v14  }
  0x7d   : > { %961 = vset.pattern.permute.xlu1 %v1050_v23 }
  0x7e   : > { %644 = vperm.xlu1 %961, %v323_v14  }
  0x82   : > { %962 = vset.pattern.permute.xlu1 %v1051_v24 }
  0x83   : > { %654 = vperm.xlu1 %962, %v323_v14  }
  0x87   : > { %964 = vset.pattern.permute.xlu1 %v1052_v25 }
  0x88   : > { %674 = vperm.xlu1 %964, %v323_v14  }
  0x8c   : > { %965 = vset.pattern.permute.xlu1 %v1053_v26 }
  0x8d   : > { %684 = vperm.xlu1 %965, %v323_v14  }
  0x8e   : > { %v394_v28 = vpop.permute.xlu1 %393  ;;  %v361_v33 = vpop.permute.xlu0 %360 }
  0x91   : > { %967 = vset.pattern.permute.xlu1 %v1054_v27 }
  0x92   : > { %704 = vperm.xlu1 %967, %v323_v14   ;;  %v427_v38 = vpop.permute.xlu0 %426 }
  0x93   : > { %v410_v30 = vpop.permute.xlu1 %409  ;;  %v438_v11 = vmul.f32 %v437_v3, %v427_v38 }
  0x96   : > { %968 = vset.pattern.permute.xlu1 %v1055_v29  ;;  %v493_v41 = vpop.permute.xlu0 %492 }
  0x97   : > { %714 = vperm.xlu1 %968, %v323_v14   ;;  %v353_v32 = vpop.permute.xlu1 %352  ;;  %v453_v14 = vrot.slane %v1177_v8, %v1230_v50 }
  0x98   : > { %v354_v49 = vmul.f32 %v870_v45, %v353_v32 }
  0x9a   : > { %v371_v52 = vrot.slane %v354_v49, %v1227_v48  ;;  %v387_v53 = vrot.slane %v354_v49, %v1230_v50  ;;  %v403_v61 = vrot.slane %v354_v49, %v1235_v55  ;;  %v419_v63 = vrot.slane %v354_v49, %v1238_v60 }
  0x9b   : > { %970 = vset.pattern.permute.xlu1 %v1039_v2  ;;  %v378_v46 = vpop.permute.xlu0 %377 }
  0x9c   : > { %735 = vperm.xlu1 %970, %v326_v31   ;;  %v372_v56 = vmul.f32 %v371_v52, %v361_v33  ;;  %v388_v57 = vmul.f32 %v387_v53, %v378_v46  ;;  %v404_v0 = vmul.f32 %v403_v61, %v394_v28  ;;  %v420_v9 = vmul.f32 %v419_v63, %v410_v30 }
  0x9e   : > { %v390_v62 = vadd.f32 %v388_v57, %v372_v56 }
  0x9f   : > { %v444_v36 = vpop.permute.xlu1 %443  ;;  %v356_v51 = vpop.permute.xlu0 %355 }
  0xa0   : > { %766 = vperm.xlu1 %970, %v327_v35   ;;  %v406_v4 = vadd.f32 %v404_v0, %v390_v62  ;;  %v454_v18 = vmul.f32 %v453_v14, %v444_v36  ;;  %v357_v20 = vmul.f32 %v871_v15, %v356_v51 }
  0xa2   : > { %v422_v12 = vadd.f32 %v420_v9, %v406_v4  ;;  %v503_v27 = vrot.slane %v357_v20, %v1227_v48  ;;  %v519_v32 = vrot.slane %v357_v20, %v1230_v50  ;;  %v535_v36 = vrot.slane %v357_v20, %v1235_v55 }
  0xa3   : > { %v448_v58 = vpop.permute.xlu0 %447  ;;  %v551_v46 = vrot.slane %v357_v20, %v1238_v60 }
  0xa4   : > { %v460_v39 = vpop.permute.xlu1 %459  ;;  %v440_v16 = vadd.f32 %v438_v11, %v422_v12  ;;  %v504_v31 = vmul.f32 %v503_v27, %v493_v41 }
  0xa5   : > { %v470_v25 = vmul.f32 %v469_v19, %v460_v39 }
  0xa6   : > { %v456_v23 = vadd.f32 %v454_v18, %v440_v16  ;;  %v619_v18 = vsub.s32 4, %v1224_v43 }
  0xa8   : > { %v526_v2 = vpop.permute.xlu0 %525  ;;  %v472_v28 = vadd.f32 %v470_v25, %v456_v23 }
  0xa9   : > { %v366_v42 = vpop.permute.xlu1 %365  ;;  %v536_v49 = vmul.f32 %v535_v36, %v526_v2 }
  0xaa   : > { %v373_v34 = vmul.f32 %v371_v52, %v366_v42 }
  0xac   : > { %v530_v13 = vpop.permute.xlu0 %529 }
  0xae   : > { %v382_v47 = vpop.permute.xlu1 %381 }
  0xaf   : > { %v389_v29 = vmul.f32 %v387_v53, %v382_v47  ;;  %v455_v53 = vmul.f32 %v453_v14, %v448_v58  ;;  %v537_v14 = vmul.f32 %v535_v36, %v530_v13 }
  0xb1   : > { %v476_v22 = vpop.permute.xlu0 %475  ;;  %v391_v37 = vadd.f32 %v389_v29, %v373_v34 }
  0xb2   : > { %v486_v26 = vmul.f32 %v485_v21, %v476_v22 }
  0xb3   : > { %v398_v54 = vpop.permute.xlu1 %397 }
  0xb4   : > { %v488_v30 = vadd.f32 %v486_v26, %v472_v28  ;;  %v405_v35 = vmul.f32 %v403_v61, %v398_v54 }
  0xb5   : > { %v480_v0 = vpop.permute.xlu0 %479 }
  0xb6   : > { %v506_v8 = vadd.f32 %v504_v31, %v488_v30  ;;  %v407_v39 = vadd.f32 %v405_v35, %v391_v37  ;;  %v629_v31 = vsub.s32 5, %v1224_v43 }
  0xb8   : > { %v510_v59 = vpop.permute.xlu1 %509 }
  0xb9   : > { %v520_v38 = vmul.f32 %v519_v32, %v510_v59  ;;  %v487_v59 = vmul.f32 %v485_v21, %v480_v0  ;;  %v546_v15 = vpop.permute.xlu0 %545 }
  0xba   : > { %v553_v20 = vmul.f32 %v551_v46, %v546_v15 }
  0xbb   : > { %v522_v47 = vadd.f32 %v520_v38, %v506_v8  ;;  %v649_v38 = vsub.s32 7, %v1224_v43 }
  0xbd   : > { %v414_v1 = vpop.permute.xlu1 %413  ;;  %v538_v52 = vadd.f32 %v536_v49, %v522_v47 }
  0xbe   : > { %v421_v40 = vmul.f32 %v419_v63, %v414_v1 }
  0xc0   : > { %v423_v51 = vadd.f32 %v421_v40, %v407_v39 }
  0xc2   : > { %v432_v10 = vpop.permute.xlu1 %431 }
  0xc3   : > { %v439_v45 = vmul.f32 %v437_v3, %v432_v10 }
  0xc5   : > { %v441_v56 = vadd.f32 %v439_v45, %v423_v51 }
  0xc7   : > { %v542_v17 = vpop.permute.xlu1 %541  ;;  %v457_v54 = vadd.f32 %v455_v53, %v441_v56 }
  0xc8   : > { %v552_v57 = vmul.f32 %v551_v46, %v542_v17 }
  0xca   : > { %v554_v61 = vadd.f32 %v552_v57, %v538_v52 }
  0xcc   : > { %v464_v24 = vpop.permute.xlu1 %463 }
  0xcd   : > { %v471_v42 = vmul.f32 %v469_v19, %v464_v24 }
  0xcf   : > { %v473_v63 = vadd.f32 %v471_v42, %v457_v54 }
  0xd1   : > { %v559_v33 = vpop.permute.xlu1 %558  ;;  %v489_v9 = vadd.f32 %v487_v59, %v473_v63 }
  0xd2   : > { %v566_v1 = vadd.f32 %v559_v33, %v554_v61  ;;  %v639_v33 = vsub.s32 6, %v1224_v43 }
  0xd4   : > { %v568_v6 = vmax.f32 %v566_v1, 0.0 }
  0xd5   : > { %v498_v44 = vpop.permute.xlu1 %497 }
  0xd6   : > { %v505_v4 = vmul.f32 %v503_v27, %v498_v44  ;;  %v570_v11 = vmul.f32 %v1168_v5, %v568_v6 }
  0xd8   : > { %v507_v10 = vadd.f32 %v505_v4, %v489_v9  ;;  %v590_v17 = vrot.slane %v570_v11, %v1230_v50  ;;  %v580_v21 = vrot.slane %v570_v11, %v1227_v48  ;;  %v600_v23 = vrot.slane %v570_v11, %v1235_v55 }
  0xd9   : > { %v610_v27 = vrot.slane %v570_v11, %v1238_v60  ;;  %v620_v30 = vrot.slane %v570_v11, %v619_v18  ;;  %v630_v8 = vrot.slane %v570_v11, %v629_v31  ;;  %v640_v44 = vrot.slane %v570_v11, %v639_v33 }
  0xda   : > { %v514_v41 = vpop.permute.xlu1 %513  ;;  %v650_v56 = vrot.slane %v570_v11, %v649_v38 }
  0xdb   : > { %v521_v2 = vmul.f32 %v519_v32, %v514_v41  ;;  %v564_v32 = vpop.permute.xlu0 %563 }
  0xdd   : > { %v523_v58 = vadd.f32 %v521_v2, %v507_v10 }
  0xdf   : > { %v575_v62 = vpop.permute.xlu1 %574  ;;  %v539_v16 = vadd.f32 %v537_v14, %v523_v58  ;;  %v635_v49 = vpop.permute.xlu0 %634 }
  0xe0   : > { %v581_v25 = vmul.f32 %v580_v21, %v575_v62  ;;  %v641_v51 = vmul.f32 %v640_v44, %v635_v49 }
  0xe1   : > { %v555_v24 = vadd.f32 %v553_v20, %v539_v16 }
  0xe3   : > { %v567_v34 = vadd.f32 %v564_v32, %v555_v24  ;;  %v665_v59 = vpop.permute.xlu0 %664 }
  0xe4   : > { %v585_v3 = vpop.permute.xlu1 %584 }
  0xe5   : > { %v591_v22 = vmul.f32 %v590_v17, %v585_v3  ;;  %v569_v39 = vmax.f32 %v567_v34, 0.0 }
  0xe7   : > { %v592_v28 = vadd.f32 %v591_v22, %v581_v25  ;;  %v571_v41 = vmul.f32 %v1168_v5, %v569_v39 }
  0xe9   : > { %v595_v12 = vpop.permute.xlu1 %594  ;;  %v660_v52 = vrot.slane %v571_v41, %v1227_v48  ;;  %v670_v61 = vrot.slane %v571_v41, %v1230_v50  ;;  %v680_v4 = vrot.slane %v571_v41, %v1235_v55  ;;  %v690_v9 = vrot.slane %v571_v41, %v1238_v60 }
  0xea   : > { %v601_v26 = vmul.f32 %v600_v23, %v595_v12  ;;  %v700_v10 = vrot.slane %v571_v41, %v619_v18  ;;  %v695_v12 = vpop.permute.xlu0 %694  ;;  %v710_v15 = vrot.slane %v571_v41, %v629_v31  ;;  %v720_v20 = vrot.slane %v571_v41, %v639_v33 }
  0xeb   : > { %v671_v63 = vmul.f32 %v670_v61, %v665_v59 }
  0xec   : > { %v602_v35 = vadd.f32 %v601_v26, %v592_v28  ;;  %v701_v14 = vmul.f32 %v700_v10, %v695_v12 }
  0xee   : > { %v605_v19 = vpop.permute.xlu1 %604  ;;  %v725_v21 = vpop.permute.xlu0 %724 }
  0xef   : > { %v611_v13 = vmul.f32 %v610_v27, %v605_v19  ;;  %v730_v19 = vrot.slane %v571_v41, %v649_v38 }
  0xf1   : > { %v612_v37 = vadd.f32 %v611_v13, %v602_v35  ;;  %v731_v24 = vmul.f32 %v730_v19, %v725_v21 }
  0xf3   : > { %v615_v29 = vpop.permute.xlu1 %614 }
  0xf4   : > { %v621_v36 = vmul.f32 %v620_v30, %v615_v29 }
  0xf6   : > { %v622_v45 = vadd.f32 %v621_v36, %v612_v37 }
  0xf8   : > { %v625_v40 = vpop.permute.xlu1 %624 }
  0xf9   : > { %v631_v46 = vmul.f32 %v630_v8, %v625_v40 }
  0xfb   : > { %v632_v47 = vadd.f32 %v631_v46, %v622_v45 }
  0xfd   : > { %v645_v53 = vpop.permute.xlu1 %644  ;;  %v642_v57 = vadd.f32 %v641_v51, %v632_v47 }
  0xfe   : > { %v651_v42 = vmul.f32 %v650_v56, %v645_v53  ;;  %v773_v53 = vpop.permute.xlu0 %772 }
 0x100   : > { %v652_v43 = vadd.f32 %v651_v42, %v642_v57 }
 0x102   : > { %v655_v54 = vpop.permute.xlu1 %654 }
 0x103   : > { %v661_v62 = vmul.f32 %v660_v52, %v655_v54 }
 0x105   : > { %v662_v0 = vadd.f32 %v661_v62, %v652_v43 }
 0x107   : > { %v675_v1 = vpop.permute.xlu1 %674  ;;  %v672_v3 = vadd.f32 %v671_v63, %v662_v0 }
 0x108   : > { %v681_v6 = vmul.f32 %v680_v4, %v675_v1 }
 0x10a   : > { %v682_v11 = vadd.f32 %v681_v6, %v672_v3 }
 0x10c   : > { %v685_v2 = vpop.permute.xlu1 %684 }
 0x10d   : > { %v691_v58 = vmul.f32 %v690_v9, %v685_v2 }
 0x10f   : > { %v692_v48 = vadd.f32 %v691_v58, %v682_v11 }
 0x111   : > { %v705_v50 = vpop.permute.xlu1 %704  ;;  %v702_v16 = vadd.f32 %v701_v14, %v692_v48 }
 0x112   : > { %v711_v17 = vmul.f32 %v710_v15, %v705_v50 }
 0x114   : > { %v712_v55 = vadd.f32 %v711_v17, %v702_v16 }
 0x116   : > { %v715_v22 = vpop.permute.xlu1 %714 }
 0x117   : > { %v721_v23 = vmul.f32 %v720_v20, %v715_v22 }
 0x119   : > { %v722_v25 = vadd.f32 %v721_v23, %v712_v55 }
 0x11b   : > { %v736_v60 = vpop.permute.xlu1 %735  ;;  %v732_v26 = vadd.f32 %v731_v24, %v722_v25 }
 0x11d   : > { %v738_v18 = vadd.f32 %v736_v60, %v732_v26 }
 0x11f   : > { %v739_v27 = vmul.f32 %v1168_v5, %v738_v18  ;;  %v767_v41 = vpop.permute.xlu1 %766 }
 0x121   : > { %v740_v28 = vadd.f32 %v739_v27, %v1173_v7 }
 0x123   : > { %v742_v13 = vsel %vm741_vm2, %v740_v28, 0.0 }
 0x124   : > { %v743_v29 = vrot.slane %v742_v13, 4 }
 0x126   : > { %v744_v30 = vadd.f32 %v743_v29, %v742_v13 }
 0x128   : > { %v745_v31 = vrot.slane %v744_v30, 2 }
 0x12a   : > { %v746_v32 = vadd.f32 %v745_v31, %v744_v30 }
 0x12c   : > { %v747_v33 = vrot.slane %v746_v32, 1 }
 0x12e   : > { %v748_v34 = vadd.f32 %v747_v33, %v746_v32 }
 0x130   : > { %v750_v35 = vmul.f32 0.25, %v748_v34 }
 0x132   : > { %v751_v36 = vsub.f32 %v740_v28, %v750_v35 }
 0x134   : > { %v752_v37 = vmul.f32 %v751_v36, %v751_v36 }
 0x136   : > { %v753_v8 = vsel %vm741_vm2, %v752_v37, 0.0 }
 0x137   : > { %v754_v38 = vrot.slane %v753_v8, 4 }
 0x139   : > { %v755_v40 = vadd.f32 %v754_v38, %v753_v8 }
 0x13b   : > { %v756_v44 = vrot.slane %v755_v40, 2 }
 0x13d   : > { %v757_v39 = vadd.f32 %v756_v44, %v755_v40 }
 0x13f   : > { %v758_v45 = vrot.slane %v757_v39, 1 }
 0x141   : > { %v759_v46 = vadd.f32 %v758_v45, %v757_v39 }
 0x143   : > { %v760_v7 = vmul.f32 0.25, %v759_v46 }
 0x145   : > { %v761_v49 = vadd.f32 1e-05, %v760_v7 }
 0x147   : > { %972 = vrsqrt.f32 %v761_v49 }
 0x151   : > { %v973_v47 = vpop.eup %972 }
 0x152   : > { %v763_v51 = vmul.f32 %v973_v47, %v751_v36 }
 0x154   : > { %v769_v56 = vmul.f32 %v767_v41, %v763_v51 }
 0x156   : > { %v775_v57 = vadd.f32 %v773_v53, %v769_v56 }
 0x158   : > { %v776_v42 = vmul.f32 %v1168_v5, %v775_v57 }
 0x15a   : > { %777 = vst [vmem:[%s307_s12] sm:$0xf] %v776_v42 }
 0x15b   : > { %987 = shalt.err (!%p984_p3)
}
 0x15c   : > { %s988_s24 = scalar_lea.hbm %s1276_s19, 64  ;;  %s992_s10 = scalar_lea.hbm %s1326_s8, 128 }
 0x15d   : > { %p989_p4 = scmp.ne.s32.totalorder %s1276_s19, %s988_s24  ;;  %p993_p9 = scmp.lt.u32.totalorder %s1276_s19, %s1326_s8 }
 0x15e   : > { %p994_p10 = scmp.lt.u32.totalorder %s992_s10, %s988_s24  ;;  %p996_p12 = scmp.lt.u32.totalorder %s988_s24, %s1276_s19 }
 0x15f   : > { %p990_p7 = pnand %p989_p4, %p1141_p5 }
 0x160   : > { %p995_p11 = por %p994_p10, %p993_p9 }
 0x161   : > { %p991_p8 = pneg %p990_p7 }
 0x162   : > { %p997_p13 = por %p996_p12, %p995_p11 }
 0x164   : > { %p998_p0 = pnand %p997_p13, %p991_p8 }
 0x166   : > { %1001 = shalt.err (!%p998_p0)
}
 0x167   : > { %877 = dma.vmem_to_hbm [thread:$0]  (%p1141_p5), %s1278_s13, 64, %s1276_s19, %s779_s20  }
 0x168 PF: > { %p883_p1 = scmp.ge.s32.totalorder %s1036_s30, 2  ;;  %s804_s18 = sand.u32 1, %s1024_s27  }
 0x169   : > { %s805_s21 = scalar_lea.sflag [#allocation3], %s804_s18 }
 0x16a   : > { %p880_p2 = pnand %p883_p1, %p1145_p6 }
 0x16c   : > { %1019 = dma.done.wait (!%p880_p2), %s805_s21, 64  }
 0x16d   : > { %1021 = vsyncadd (!%p880_p2), %s805_s21, 4294967232  ;;  %p18_p3 = scmp.ge.s32.totalorder %s1128_s11, 4   ;;  %s1329_s27 = smov %s1028_s28 }
 0x16e   : > { %s1330_s28 = smov %s1032_s29  ;;  %s1331_s29 = smov %s1139_s14 }
 0x16f   : > { %s1332_s30 = smov %s1128_s11  ;;  %20 = sbr.rel (!%p18_p3) target bundleno = 3 (0x3), region = 92 }
 0x176   :  { %810 = vsyncpa [#allocation3], 1 }
 0x177   :  { %812 = vsyncpa [#allocation3 + $0x1], 1 }

</bundles_post_ra>
